<compile_context>
chip_gen: v7x
topology: tpu7x:2x2x1
jax: 0.10.0
libtpu: 0.0.40
codegen_flags: <defaults>
</compile_context>

<pallas_src>
import math

import jax
import jax.numpy as jnp
from jax.experimental import pallas as pl
from jax.experimental.pallas import tpu as pltpu


def _make_dyt_kernel(compute_dtype):
    def dyt_kernel(alpha_ref, w_ref, b_ref, x_ref, o_ref):
        # alpha_ref: SMEM (1,) f32 scalar.
        # w_ref, b_ref: VMEM (1, F_eff), already in compute_dtype (no per-step casts).
        # x_ref, o_ref: VMEM (row_tile, F_eff) streaming tiles in the I/O dtype.
        alpha = alpha_ref[0].astype(compute_dtype)       # scalar cast, negligible
        x = x_ref[...].astype(compute_dtype)
        y = jnp.tanh(alpha * x) * w_ref[...] + b_ref[...]
        o_ref[...] = y.astype(o_ref.dtype)
    return dyt_kernel


def _tpu_generation_info():
    """Best-effort (vmem_capacity_bytes_per_core, bf16_native_ok)."""
    vmem_cap = None
    try:
        info = pltpu.get_tpu_info()
        vmem_cap = int(getattr(info, "vmem_capacity_bytes"))
    except Exception:
        vmem_cap = None
    kind = ""
    try:
        kind = str(getattr(jax.devices()[0], "device_kind", "")).lower()
    except Exception:
        kind = ""
    # Native bf16 VPU/EUP only on v6e / v7x.  Unknown chip -> safe f32 compute.
    bf16_native_ok = ("v6" in kind) or ("v7" in kind) or ("tpu7" in kind)
    if not vmem_cap or vmem_cap <= 0:
        # v7x: 64 MiB VMEM per TensorCore; v5e/v6e: 128 MiB.
        vmem_cap = (64 << 20) if (("v7" in kind) or ("tpu7" in kind)) else (128 << 20)
    return vmem_cap, bf16_native_ok


def dyt_forward(x, alpha, weight, bias):
    """x: (..., F); alpha: (1,) f32; weight/bias: (F,).  Returns same shape/dtype as x."""
    orig_shape = x.shape
    F = orig_shape[-1]
    total = int(x.size)
    M = total // F
    io_dtype = x.dtype
    itemsize = jnp.dtype(io_dtype).itemsize

    vmem_cap, bf16_native_ok = _tpu_generation_info()

    # Compute dtype: bf16-native on v6e/v7x (halves in-core bundles for bf16 I/O,
    # keeps the kernel HBM-bound at 3.2 TB/s); f32 everywhere else.
    if jnp.dtype(io_dtype) == jnp.dtype(jnp.bfloat16) and bf16_native_ok:
        compute_dtype = jnp.bfloat16
    else:
        compute_dtype = jnp.float32

    # --- lane-dense repacking (unmasked full-width stores) ------------------
    F_eff, M_eff = F, M
    w_host, b_host = weight, bias
    if F % 128 != 0:
        base = (F * 128) // math.gcd(F, 128)              # lcm(F, 128)
        chosen = None
        for k in (16, 8, 4, 2, 1):                        # prefer the widest row
            L = base * k
            if L <= 4096 and total % L == 0:
                chosen = L
                break
        if chosen is not None:
            F_eff = chosen
            M_eff = total // F_eff
            reps = F_eff // F
            w_host = jnp.tile(weight, reps)
            b_host = jnp.tile(bias, reps)
        # else: fall back to F_eff = F (masked stores).  jnp.pad would cost two
        # extra full HBM passes, which is worse for this pure streaming op.

    x2 = x.reshape(M_eff, F_eff)
    w2 = w_host.astype(compute_dtype).reshape(1, F_eff)
    b2 = b_host.astype(compute_dtype).reshape(1, F_eff)
    alpha2 = alpha.astype(jnp.float32).reshape(1)

    # --- generation-aware tile sizing & scoped-VMEM budget -------------------
    # Budget = double-buffered input + output tiles (4x tile) + params + headroom.
    scoped_cap = min((vmem_cap * 5) // 8, 80 << 20)       # ~40 MiB on v7x, 80 MiB on v5e/v6e
    target_tile_bytes = min(16 << 20, max(2 << 20, (scoped_cap - (6 << 20)) // 4))

    rows = target_tile_bytes // max(F_eff * itemsize, 1)
    rows = (rows // 32) * 32                               # multiple of 32: covers bf16/int8 sublane mins
    if rows < 32:
        rows = {4: 8, 2: 16, 1: 32}.get(itemsize, 8)       # degenerate very-wide-F fallback
    if rows >= M_eff:
        row_tile = M_eff                                   # full-dim block: exempt from (8,128) divisibility
    else:
        row_tile = rows

    grid = (pl.cdiv(M_eff, row_tile),)                     # ragged last block handled by Pallas masking

    tile_bytes = row_tile * F_eff * itemsize
    vmem_limit = int(min(scoped_cap, max(32 << 20, 4 * tile_bytes + (6 << 20))))

    cost = pl.CostEstimate(
        flops=3 * total,
        transcendentals=total,
        bytes_accessed=2 * total * itemsize
        + 2 * F_eff * jnp.dtype(compute_dtype).itemsize + 4,
    )

    kernel = _make_dyt_kernel(compute_dtype)

    out = pl.pallas_call(
        kernel,
        out_shape=jax.ShapeDtypeStruct((M_eff, F_eff), io_dtype),
        grid_spec=pltpu.PrefetchScalarGridSpec(
            num_scalar_prefetch=0,
            grid=grid,
            in_specs=[
                pl.BlockSpec(memory_space=pltpu.SMEM),              # alpha (scalar)
                pl.BlockSpec((1, F_eff), lambda i: (0, 0)),          # weight (VMEM-resident)
                pl.BlockSpec((1, F_eff), lambda i: (0, 0)),          # bias   (VMEM-resident)
                pl.BlockSpec((row_tile, F_eff), lambda i: (i, 0)),   # x tile (streamed)
            ],
            out_specs=pl.BlockSpec((row_tile, F_eff), lambda i: (i, 0)),
        ),
        compiler_params=pltpu.CompilerParams(
            # Row axis is fully parallel; lets the grid shard across both v7x TCs.
            # TODO(synk): confirm on an xprof trace that both v7x TensorCores are
            # busy; if not, switch this axis to pltpu.CORE_PARALLEL.
            dimension_semantics=("parallel",),
            vmem_limit_bytes=vmem_limit,
        ),
        cost_estimate=cost,
    )(alpha2, w2, b2, x2)

    return out.reshape(orig_shape)


def dyt_reference(x, alpha, weight, bias):
    xf = x.astype(jnp.float32)
    return jnp.tanh(alpha[0] * xf) * weight.astype(jnp.float32) + bias.astype(jnp.float32)


if __name__ == "__main__":
    key = jax.random.PRNGKey(0)
    batch, seq, num_features = 2, 8, 32

    # Deterministic parameter init, matching nn.Module __init__:
    #   alpha = 0.5, weight = ones, bias = zeros
    alpha = jnp.full((1,), 0.5, dtype=jnp.float32)
    weight = jnp.ones((num_features,), dtype=jnp.float32)
    bias = jnp.zeros((num_features,), dtype=jnp.float32)

    x = jax.random.normal(key, (batch, seq, num_features), dtype=jnp.float32)

    # --- main check: small f32 shape (exercises F<128 lane-dense repacking) ---
    out = jax.block_until_ready(dyt_forward(x, alpha, weight, bias))
    ref = dyt_reference(x, alpha, weight, bias)
    assert out.shape == x.shape
    assert jnp.allclose(out, ref, atol=1e-5, rtol=1e-5)

    # --- secondary check: F>=128 path with ragged row count (no pad/slice) ---
    F2 = 256
    x2 = jax.random.normal(jax.random.PRNGKey(1), (3, 7, F2), dtype=jnp.float32)
    w2 = jax.random.normal(jax.random.PRNGKey(2), (F2,), dtype=jnp.float32)
    b2 = jax.random.normal(jax.random.PRNGKey(3), (F2,), dtype=jnp.float32)
    out2 = jax.block_until_ready(dyt_forward(x2, alpha, w2, b2))
    ref2 = dyt_reference(x2, alpha, w2, b2)
    assert jnp.allclose(out2, ref2, atol=1e-5, rtol=1e-5)

    # --- bf16 I/O check (native bf16 compute on v6e/v7x, f32 compute on v5e) ---
    x3 = x2.astype(jnp.bfloat16)
    out3 = jax.block_until_ready(
        dyt_forward(x3, alpha, w2.astype(jnp.bfloat16), b2.astype(jnp.bfloat16)))
    assert out3.dtype == jnp.bfloat16
    ref3 = dyt_reference(x3, alpha, w2.astype(jnp.bfloat16), b2.astype(jnp.bfloat16))
    # Looser tolerance so the check is valid for the bf16-native compute path.
    assert jnp.allclose(out3.astype(jnp.float32), ref3, atol=5e-2, rtol=5e-2)

    print("KERNEL_OK")
</pallas_src>

<mosaic_0001>
module attributes {stable_mosaic.version = 11 : i64} {
  func.func @dyt_kernel(%arg0: i32, %arg1: memref<1xf32, #tpu.memory_space<smem>>, %arg2: memref<1x512xf32, #tpu.memory_space<vmem>>, %arg3: memref<1x512xf32, #tpu.memory_space<vmem>>, %arg4: memref<1x512xf32, #tpu.memory_space<vmem>>, %arg5: memref<1x512xf32, #tpu.memory_space<vmem>>) attributes {dimension_semantics = [#tpu.dimension_semantics<parallel>], iteration_bounds = array<i64: 1>, scalar_prefetch = 0 : i64, scratch_operands = 0 : i64, tpu.core_type = #tpu.core_type<tc>, window_params = [{transform_indices = @transform_0, window_bounds = array<i64: 1>}, {pipeline_mode = #tpu.pipeline_mode<synchronous>, transform_indices = @transform_1, window_bounds = array<i64: 1, 512>}, {pipeline_mode = #tpu.pipeline_mode<synchronous>, transform_indices = @transform_2, window_bounds = array<i64: 1, 512>}, {transform_indices = @transform_3, window_bounds = array<i64: 1, 512>}, {transform_indices = @transform_4, window_bounds = array<i64: 1, 512>}]} {
    %c0 = arith.constant 0 : index
    %0 = memref.load %arg1[%c0] : memref<1xf32, #tpu.memory_space<smem>>
    %c0_0 = arith.constant 0 : index
    %c0_1 = arith.constant 0 : index
    %1 = vector.load %arg4[%c0_0, %c0_1] : memref<1x512xf32, #tpu.memory_space<vmem>>, vector<1x512xf32>
    %2 = vector.broadcast %0 : f32 to vector<1x512xf32>
    %3 = arith.mulf %2, %1 : vector<1x512xf32>
    %4 = math.tanh %3 : vector<1x512xf32>
    %c0_2 = arith.constant 0 : index
    %c0_3 = arith.constant 0 : index
    %5 = vector.load %arg2[%c0_2, %c0_3] : memref<1x512xf32, #tpu.memory_space<vmem>>, vector<1x512xf32>
    %6 = arith.mulf %4, %5 : vector<1x512xf32>
    %c0_4 = arith.constant 0 : index
    %c0_5 = arith.constant 0 : index
    %7 = vector.load %arg3[%c0_4, %c0_5] : memref<1x512xf32, #tpu.memory_space<vmem>>, vector<1x512xf32>
    %8 = arith.addf %6, %7 : vector<1x512xf32>
    %c0_6 = arith.constant 0 : index
    %c0_7 = arith.constant 0 : index
    %9 = vector.load %arg5[%c0_6, %c0_7] : memref<1x512xf32, #tpu.memory_space<vmem>>, vector<1x512xf32>
    tpu.vector_store %arg5[%c0_6, %c0_7], %8 {strides = array<i32>} : memref<1x512xf32, #tpu.memory_space<vmem>>, vector<1x512xf32>,
    return
  }
  func.func @transform_0(%arg0: i32) -> i32 {
    %c0_i32 = arith.constant 0 : i32
    %c0_i32_0 = arith.constant 0 : i32
    return %c0_i32 : i32
  }
  func.func @transform_1(%arg0: i32) -> (i32, i32) {
    %c0_i32 = arith.constant 0 : i32
    %c0_i32_0 = arith.constant 0 : i32
    %c0_i32_1 = arith.constant 0 : i32
    return %c0_i32, %c0_i32_0 : i32, i32
  }
  func.func @transform_2(%arg0: i32) -> (i32, i32) {
    %c0_i32 = arith.constant 0 : i32
    %c0_i32_0 = arith.constant 0 : i32
    %c0_i32_1 = arith.constant 0 : i32
    return %c0_i32, %c0_i32_0 : i32, i32
  }
  func.func @transform_3(%arg0: i32) -> (i32, i32) {
    %c0_i32 = arith.constant 0 : i32
    %c0_i32_0 = arith.constant 0 : i32
    return %arg0, %c0_i32 : i32, i32
  }
  func.func @transform_4(%arg0: i32) -> (i32, i32) {
    %c0_i32 = arith.constant 0 : i32
    %c0_i32_0 = arith.constant 0 : i32
    return %arg0, %c0_i32 : i32, i32
  }
}

</mosaic_0001>

<bundles_post_ra>
// kernel: tpu_custom_call.1
= control target key start
LH: loop header
LB: loop body
LE: loop exit
PB: predicated region body
PF: predicated region fallthrough
CT: control target
= control target key end

     0   :  { %10 = vsyncpa [#allocation4], 0  ;;  %s172_s0 = inlined_call_operand.<no memory space> [shape: f32[1], index: 0, kind: input, shape index: {}]   ;;  %s173_s1 = inlined_call_operand.hbm [shape: f32[1,512], index: 1, kind: input, shape index: {}]   ;;  %s174_s2 = inlined_call_operand.vmem [shape: f32[1,512], index: 2, kind: input, shape index: {}]   ;;  %s175_s3 = inlined_call_operand.vmem [shape: f32[1,512], index: 3, kind: input, shape index: {}]   ;;  %s176_s4 = inlined_call_operand.hbm [shape: f32[1,512], index: 4, kind: output, shape index: {}]  }
   0x1   :  { %11 = vsyncpa [#allocation5], 0  ;;  %s112_s15 = smov [#allocation3]   ;;  %s64_s19 = scalar_lea.hbm %s173_s1, 64 }
   0x2   :  { %s20_s16 = sshll.u32 %s112_s15, 4  ;;  %p65_p0 = scmp.ne.s32.totalorder %s173_s1, %s64_s19  ;;  %s21_s16 = int_to_ptr.vmem [resolvable:$true] %s20_s16 }
   0x3   :  { %p68_p1 = scmp.lt.u32.totalorder %s64_s19, %s173_s1 }
   0x5   :  { %p70_p2 = pnand %p68_p1, %p65_p0 }
   0x7   :  { %73 = shalt.err (!%p70_p2)
}
   0x8   :  { %s74_s24 = scalar_lea.vmem %s21_s16, 64  ;;  %p79_p4 = scmp.lt.s32.totalorder %s21_s16, %s21_s16 }
   0x9   :  { %p75_p3 = scmp.ne.s32.totalorder %s21_s16, %s74_s24  ;;  %p80_p5 = scmp.lt.s32.totalorder %s74_s24, %s74_s24 }
   0xb   :  { %p81_p6 = por %p80_p5, %p79_p4 }
   0xd   :  { %p82_p7 = pnand %p81_p6, %p75_p3 }
   0xf   :  { %85 = shalt.err (!%p82_p7)
}
  0x10   :  { %23 = dma.hbm_to_vmem [thread:$0]  %s173_s1, 64, %s21_s16, [#allocation4]  }
  0x11   :  { %108 = dma.done.wait [#allocation4], 64  }
  0x12   :  { %109 = vsyncadd [#allocation4], 4294967232  ;;  %v33_v0 = vstv %s172_s0  ;;  %v32_v1 = vld [vmem:[%s175_s3] sm:$0xf]  ;;  %v40_v4 = vlaneseq  ;;  %s113_s1 = smov [#allocation6]  }
  0x13   :  { %v34_v2 = vmul.f32 %v33_v0, %v32_v1  ;;  %v36_v3 = vld [vmem:[#allocation3] sm:$0xf]  ;;  %s51_s7 = sshll.u32 %s113_s1, 4  ;;  %s52_s7 = int_to_ptr.vmem [resolvable:$true] %s51_s7 }
  0x14   :  { %v38_v6 = vld [vmem:[%s174_s2] sm:$0xf]  ;;  %vm42_vm0 = vcmp.lt.s32.totalorder %v40_v4, 512  ;;  %s86_s0 = scalar_lea.vmem %s52_s7, 64  ;;  %p91_p9 = scmp.lt.s32.totalorder %s52_s7, %s52_s7 }
  0x15   :  { %62 = vtanh.f32 %v34_v2  ;;  %p87_p8 = scmp.ne.s32.totalorder %s52_s7, %s86_s0  ;;  %p92_p10 = scmp.lt.s32.totalorder %s86_s0, %s86_s0 }
  0x17   :  { %p93_p11 = por %p92_p10, %p91_p9 }
  0x19   :  { %p94_p12 = pnand %p93_p11, %p87_p8 }
  0x1f   :  { %v63_v5 = vpop.eup %62 }
  0x20   :  { %v37_v7 = vmul.f32 %v63_v5, %v36_v3 }
  0x22   :  { %v39_v8 = vadd.f32 %v38_v6, %v37_v7 }
  0x24   :  { %44 = vst.msk [vmem:[#allocation6] sm:$0xf] %vm42_vm0, %v39_v8 }
  0x25   :  { %97 = shalt.err (!%p94_p12)
}
  0x26   :  { %s98_s9 = scalar_lea.hbm %s176_s4, 64 }
  0x27   :  { %p99_p13 = scmp.ne.s32.totalorder %s176_s4, %s98_s9  ;;  %p102_p0 = scmp.lt.u32.totalorder %s98_s9, %s176_s4 }
  0x29   :  { %p104_p1 = pnand %p102_p0, %p99_p13 }
  0x2b   :  { %107 = shalt.err (!%p104_p1)
}
  0x2c   :  { %54 = dma.vmem_to_hbm [thread:$0]  %s52_s7, 64, %s176_s4, [#allocation5]  }
  0x2d   :  { %110 = dma.done.wait [#allocation5], 64  }
  0x2e   :  { %111 = vsyncadd [#allocation5], 4294967232 }
  0x2f   :  { %58 = vsyncpa [#allocation4], 1 }
  0x30   :  { %59 = vsyncpa [#allocation5], 1 }

</bundles_post_ra>
